<compile_context>
chip_gen: v7x
topology: tpu7x:2x2x1
jax: 0.10.0
libtpu: 0.0.40
codegen_flags: <defaults>
</compile_context>

<pallas_src>
import functools

import jax
import jax.numpy as jnp
from jax import lax
from jax.experimental import pallas as pl
from jax.experimental.pallas import tpu as pltpu

BN_EPS = 1e-5
LANE = 128          # output-channel lane padding
TR_MAX = 1024       # max rows per tile (both kernels)


def _round_up(x, m):
    return (x + m - 1) // m * m


@functools.lru_cache(maxsize=None)
def _vmem_limit_bytes():
    cap = 64 * 1024 * 1024
    try:
        cap = int(getattr(pltpu.get_tpu_info(), "vmem_capacity_bytes", cap))
    except Exception:
        pass
    # ~3/4 of physical: ~96 MiB on v5e/v6e (128 MiB), ~48 MiB on v7x (64 MiB).
    return min((cap * 3) // 4, 100 * 1024 * 1024)


# ------------------------------ Kernel 1 ------------------------------------ #
def _conv_stats_kernel(x_ref, w_ref, s_ref, ss_ref):
    """Per-row-tile conv (single fused matmul) -> BN partial statistics.

    x_ref : (1, TR, K)     bf16  im2col patches for this tile
    w_ref : (K, c_pad)     bf16  conv weight, C_out zero-padded to c_pad
    s_ref : (8, c_pad)     f32   per-tile channel sums (row 0, rest zero)
    ss_ref: (8, c_pad)     f32   per-tile channel sum-of-squares
    Zero-padded rows contribute exactly 0 to both (no bias), so no masking.
    """
    acc = jnp.dot(x_ref[0], w_ref[...], preferred_element_type=jnp.float32)
    s_row = jnp.sum(acc, axis=0, keepdims=True)            # (1, c_pad)
    ss_row = jnp.sum(acc * acc, axis=0, keepdims=True)     # (1, c_pad)
    row0 = lax.broadcasted_iota(jnp.int32, s_ref.shape, 0) == 0
    s_ref[...] = jnp.where(row0, s_row, 0.0)
    ss_ref[...] = jnp.where(row0, ss_row, 0.0)


# ------------------------------ Kernel 2 ------------------------------------ #
def _conv_affine_relu_kernel(x_ref, w_ref, scale_ref, shift_ref, o_ref, *, c_sub):
    """Recompute conv tile, apply folded BN affine + ReLU, store NCHW-transposed.

    x_ref   : (1, TR, K)       bf16
    w_ref   : (K, c_pad)       bf16
    scale   : (1, c_pad)       f32
    shift   : (1, c_pad)       f32
    o_ref   : (1, c_sub, TR)   f32   lane-dense (lanes = TR) NCHW slab
    """
    acc = jnp.dot(x_ref[0], w_ref[...], preferred_element_type=jnp.float32)
    act = jnp.maximum(acc * scale_ref[...] + shift_ref[...], 0.0)   # (TR, c_pad) f32
    o_ref[0] = act.T[:c_sub, :]                                     # (c_sub, TR)


# -------------------------------- Wrapper ----------------------------------- #
@functools.partial(jax.jit, static_argnames=("stride", "padding"))
def conv_bn_relu(x_nchw, weight, bias, gamma, beta, *, stride, padding):
    # Per-channel conv bias before train-mode BN is cancelled by the mean
    # subtraction (would have to be reinstated for eval-mode running stats).
    del bias
    n, c_in, h, w = x_nchw.shape
    c_out, _, kh, kw = weight.shape
    oh = (h + 2 * padding - kh) // stride + 1
    ow = (w + 2 * padding - kw) // stride + 1
    k_dim = kh * kw * c_in
    c_pad = _round_up(c_out, LANE)          # matmul / lane width
    c_sub = _round_up(c_out, 8)             # NCHW output sublane width
    m_img = oh * ow
    tr = min(TR_MAX, _round_up(m_img, LANE))
    m_pad = _round_up(m_img, tr)
    t_tiles = m_pad // tr
    vmem = _vmem_limit_bytes()

    # ---- host-side im2col (bf16): contiguous kernel loads, any stride --------
    x_nhwc = jnp.transpose(x_nchw.astype(jnp.float32), (0, 2, 3, 1))
    x_sp = jnp.pad(x_nhwc, ((0, 0), (padding, padding), (padding, padding),
                            (0, 0))).astype(jnp.bfloat16)
    taps = []
    for i in range(kh):
        for j in range(kw):
            taps.append(x_sp[:, i:i + stride * (oh - 1) + 1:stride,
                                j:j + stride * (ow - 1) + 1:stride, :])
    x_col = jnp.concatenate(taps, axis=-1).reshape(n, m_img, k_dim)
    if m_pad > m_img:
        x_col = jnp.pad(x_col, ((0, 0), (0, m_pad - m_img), (0, 0)))

    # (C_out, C_in, KH, KW) -> (KH, KW, C_in, C_out) -> (K, c_pad), bf16
    w_mat = jnp.transpose(weight.astype(jnp.float32), (2, 3, 1, 0))
    w_mat = w_mat.reshape(k_dim, c_out)
    w_mat = jnp.pad(w_mat, ((0, 0), (0, c_pad - c_out))).astype(jnp.bfloat16)

    # ---- pass 1: BN batch statistics (conv activation never hits HBM) --------
    sums, sumsq = pl.pallas_call(
        _conv_stats_kernel,
        out_shape=(
            jax.ShapeDtypeStruct((n * t_tiles * 8, c_pad), jnp.float32),
            jax.ShapeDtypeStruct((n * t_tiles * 8, c_pad), jnp.float32),
        ),
        grid_spec=pltpu.PrefetchScalarGridSpec(
            num_scalar_prefetch=0,
            grid=(n, t_tiles),
            in_specs=[
                pl.BlockSpec((1, tr, k_dim), lambda b, t: (b, t, 0)),
                pl.BlockSpec((k_dim, c_pad), lambda b, t: (0, 0)),
            ],
            out_specs=(
                pl.BlockSpec((8, c_pad), lambda b, t: (b * t_tiles + t, 0)),
                pl.BlockSpec((8, c_pad), lambda b, t: (b * t_tiles + t, 0)),
            ),
        ),
        compiler_params=pltpu.CompilerParams(
            dimension_semantics=("parallel", "parallel"),
            vmem_limit_bytes=vmem),
    )(x_col, w_mat)

    # ---- fold BN (biased batch stats) + gamma/beta into per-channel affine ---
    cnt = jnp.float32(n * m_img)
    mean = jnp.sum(sums, axis=0) / cnt
    var = jnp.maximum(jnp.sum(sumsq, axis=0) / cnt - mean * mean, 0.0)
    inv_std = lax.rsqrt(var + BN_EPS)
    gamma_p = jnp.pad(gamma.astype(jnp.float32), (0, c_pad - c_out))
    beta_p = jnp.pad(beta.astype(jnp.float32), (0, c_pad - c_out))
    scale = (gamma_p * inv_std).reshape(1, c_pad)
    shift = (beta_p - mean * gamma_p * inv_std).reshape(1, c_pad)

    # ---- pass 2: recompute conv tile, affine + ReLU, write NCHW directly -----
    out_p = pl.pallas_call(
        functools.partial(_conv_affine_relu_kernel, c_sub=c_sub),
        out_shape=jax.ShapeDtypeStruct((n, c_sub, m_pad), jnp.float32),
        grid_spec=pltpu.PrefetchScalarGridSpec(
            num_scalar_prefetch=0,
            grid=(n, t_tiles),
            in_specs=[
                pl.BlockSpec((1, tr, k_dim), lambda b, t: (b, t, 0)),
                pl.BlockSpec((k_dim, c_pad), lambda b, t: (0, 0)),
                pl.BlockSpec((1, c_pad), lambda b, t: (0, 0)),
                pl.BlockSpec((1, c_pad), lambda b, t: (0, 0)),
            ],
            out_specs=pl.BlockSpec((1, c_sub, tr), lambda b, t: (b, 0, t)),
        ),
        compiler_params=pltpu.CompilerParams(
            dimension_semantics=("parallel", "parallel"),
            vmem_limit_bytes=vmem),
    )(x_col, w_mat, scale, shift)

    # drop sublane-pad channels / pad rows (no-op at aligned sizes), to NCHW
    out = out_p[:, :c_out, :m_img].reshape(n, c_out, oh, ow)
    return out


# ------------------------------- Reference ---------------------------------- #
def _reference(x_nchw, weight, bias, gamma, beta, stride, padding):
    # Match the kernel's MXU input precision: bf16 operands, f32 accumulation.
    xr = x_nchw.astype(jnp.bfloat16).astype(jnp.float32)
    wr = weight.astype(jnp.bfloat16).astype(jnp.float32)
    y = lax.conv_general_dilated(
        xr, wr, window_strides=(stride, stride),
        padding=((padding, padding), (padding, padding)),
        dimension_numbers=("NCHW", "OIHW", "NCHW"),
    ) + bias.reshape(1, -1, 1, 1)
    mean = jnp.mean(y, axis=(0, 2, 3), keepdims=True)
    var = jnp.mean((y - mean) ** 2, axis=(0, 2, 3), keepdims=True)
    norm = (y - mean) * lax.rsqrt(var + BN_EPS)
    norm = norm * gamma.reshape(1, -1, 1, 1) + beta.reshape(1, -1, 1, 1)
    return jnp.maximum(norm, 0.0)


# ---------------------------------- Main ------------------------------------ #
if __name__ == "__main__":
    # Module config: Conv(in_ch=4, out_ch=8, kernel_size=3, stride=1, padding=1)
    in_ch, out_ch, ksize, stride, padding = 4, 8, 3, 1, 1
    N, H, W = 2, 16, 16

    key = jax.random.PRNGKey(0)
    k_x, k_w, k_b = jax.random.split(key, 3)

    x = jax.random.normal(k_x, (N, in_ch, H, W), dtype=jnp.float32)

    # PyTorch-default-like init: uniform(-1/sqrt(fan_in), +1/sqrt(fan_in))
    fan_in = in_ch * ksize * ksize
    bound = 1.0 / (fan_in ** 0.5)
    weight = jax.random.uniform(k_w, (out_ch, in_ch, ksize, ksize),
                                minval=-bound, maxval=bound, dtype=jnp.float32)
    bias = jax.random.uniform(k_b, (out_ch,), minval=-bound, maxval=bound,
                              dtype=jnp.float32)
    gamma = jnp.ones((out_ch,), jnp.float32)   # BatchNorm2d default weight
    beta = jnp.zeros((out_ch,), jnp.float32)   # BatchNorm2d default bias

    out = conv_bn_relu(x, weight, bias, gamma, beta,
                       stride=stride, padding=padding)
    out = jax.block_until_ready(out)

    ref = _reference(x, weight, bias, gamma, beta, stride, padding)
    assert out.shape == (N, out_ch, H, W), out.shape
    assert jnp.allclose(out, ref, atol=2e-3, rtol=2e-3), \
        float(jnp.max(jnp.abs(out - ref)))

    print("KERNEL_OK")
</pallas_src>

<mosaic_0001>
module attributes {stable_mosaic.version = 11 : i64} {
  func.func @_conv_stats_kernel(%arg0: i32, %arg1: i32, %arg2: memref<1x256x36xbf16, #tpu.memory_space<vmem>>, %arg3: memref<36x128xbf16, #tpu.memory_space<vmem>>, %arg4: memref<8x128xf32, #tpu.memory_space<vmem>>, %arg5: memref<8x128xf32, #tpu.memory_space<vmem>>) attributes {dimension_semantics = [#tpu.dimension_semantics<parallel>, #tpu.dimension_semantics<parallel>], iteration_bounds = array<i64: 2, 1>, scalar_prefetch = 0 : i64, scratch_operands = 0 : i64, tpu.core_type = #tpu.core_type<tc>, window_params = [{transform_indices = @transform_0, window_bounds = array<i64: 1, 256, 36>}, {pipeline_mode = #tpu.pipeline_mode<synchronous>, transform_indices = @transform_1, window_bounds = array<i64: 36, 128>}, {transform_indices = @transform_2, window_bounds = array<i64: 8, 128>}, {transform_indices = @transform_3, window_bounds = array<i64: 8, 128>}]} {
    %c0 = arith.constant 0 : index
    %c0_0 = arith.constant 0 : index
    %c0_1 = arith.constant 0 : index
    %0 = vector.load %arg2[%c0, %c0_0, %c0_1] : memref<1x256x36xbf16, #tpu.memory_space<vmem>>, vector<1x256x36xbf16>
    %1 = vector.shape_cast %0 : vector<1x256x36xbf16> to vector<256x36xbf16>
    %c0_2 = arith.constant 0 : index
    %c0_3 = arith.constant 0 : index
    %2 = vector.load %arg3[%c0_2, %c0_3] : memref<36x128xbf16, #tpu.memory_space<vmem>>, vector<36x128xbf16>
    %cst = arith.constant dense<0.000000e+00> : vector<256x128xf32>
    %3 = tpu.matmul %1, %2, %cst {dimension_numbers = #tpu.dot_dimension_numbers<[1], [0], [0], [1], [0, 0, 1, 1], [], []>} : vector<256x36xbf16>, vector<36x128xbf16>, vector<256x128xf32> -> vector<256x128xf32>
    %cst_4 = arith.constant dense<0.000000e+00> : vector<128xf32>
    %4 = vector.multi_reduction <add>, %3, %cst_4 [0] : vector<256x128xf32> to vector<128xf32>
    %5 = vector.shape_cast %4 : vector<128xf32> to vector<1x128xf32>
    %6 = arith.mulf %3, %3 : vector<256x128xf32>
    %cst_5 = arith.constant dense<0.000000e+00> : vector<128xf32>
    %7 = vector.multi_reduction <add>, %6, %cst_5 [0] : vector<256x128xf32> to vector<128xf32>
    %8 = vector.shape_cast %7 : vector<128xf32> to vector<1x128xf32>
    %9 = tpu.iota {dimensions = array<i32: 0>} : vector<8x128xi32>
    %c0_i32 = arith.constant 0 : i32
    %10 = vector.broadcast %c0_i32 : i32 to vector<8x128xi32>
    %11 = arith.cmpi eq, %9, %10 : vector<8x128xi32>
    %cst_6 = arith.constant 0.000000e+00 : f32
    %12 = vector.shape_cast %5 : vector<1x128xf32> to vector<1x128xf32>
    %13 = vector.broadcast %12 : vector<1x128xf32> to vector<8x128xf32>
    %14 = vector.broadcast %cst_6 : f32 to vector<8x128xf32>
    %15 = arith.select %11, %13, %14 : vector<8x128xi1>, vector<8x128xf32>
    %c0_7 = arith.constant 0 : index
    %c0_8 = arith.constant 0 : index
    %16 = vector.load %arg4[%c0_7, %c0_8] : memref<8x128xf32, #tpu.memory_space<vmem>>, vector<8x128xf32>
    tpu.vector_store %arg4[%c0_7, %c0_8], %15 {strides = array<i32>} : memref<8x128xf32, #tpu.memory_space<vmem>>, vector<8x128xf32>,
    %cst_9 = arith.constant 0.000000e+00 : f32
    %17 = vector.shape_cast %8 : vector<1x128xf32> to vector<1x128xf32>
    %18 = vector.broadcast %17 : vector<1x128xf32> to vector<8x128xf32>
    %19 = vector.broadcast %cst_9 : f32 to vector<8x128xf32>
    %20 = arith.select %11, %18, %19 : vector<8x128xi1>, vector<8x128xf32>
    %c0_10 = arith.constant 0 : index
    %c0_11 = arith.constant 0 : index
    %21 = vector.load %arg5[%c0_10, %c0_11] : memref<8x128xf32, #tpu.memory_space<vmem>>, vector<8x128xf32>
    tpu.vector_store %arg5[%c0_10, %c0_11], %20 {strides = array<i32>} : memref<8x128xf32, #tpu.memory_space<vmem>>, vector<8x128xf32>,
    return
  }
  func.func @transform_0(%arg0: i32, %arg1: i32) -> (i32, i32, i32) {
    %c0_i32 = arith.constant 0 : i32
    %c0_i32_0 = arith.constant 0 : i32
    return %arg0, %arg1, %c0_i32 : i32, i32, i32
  }
  func.func @transform_1(%arg0: i32, %arg1: i32) -> (i32, i32) {
    %c0_i32 = arith.constant 0 : i32
    %c0_i32_0 = arith.constant 0 : i32
    %c0_i32_1 = arith.constant 0 : i32
    return %c0_i32, %c0_i32_0 : i32, i32
  }
  func.func @transform_2(%arg0: i32, %arg1: i32) -> (i32, i32) {
    %c1_i32 = arith.constant 1 : i32
    %0 = arith.muli %arg0, %c1_i32 : i32
    %1 = arith.addi %0, %arg1 : i32
    %c0_i32 = arith.constant 0 : i32
    %c0_i32_0 = arith.constant 0 : i32
    return %1, %c0_i32 : i32, i32
  }
  func.func @transform_3(%arg0: i32, %arg1: i32) -> (i32, i32) {
    %c1_i32 = arith.constant 1 : i32
    %0 = arith.muli %arg0, %c1_i32 : i32
    %1 = arith.addi %0, %arg1 : i32
    %c0_i32 = arith.constant 0 : i32
    %c0_i32_0 = arith.constant 0 : i32
    return %1, %c0_i32 : i32, i32
  }
}

module attributes {stable_mosaic.version = 11 : i64} {
  func.func @_conv_affine_relu_kernel(%arg0: i32, %arg1: i32, %arg2: memref<1x256x36xbf16, #tpu.memory_space<vmem>>, %arg3: memref<36x128xbf16, #tpu.memory_space<vmem>>, %arg4: memref<1x128xf32, #tpu.memory_space<vmem>>, %arg5: memref<1x128xf32, #tpu.memory_space<vmem>>, %arg6: memref<1x8x256xf32, #tpu.memory_space<vmem>>) attributes {dimension_semantics = [#tpu.dimension_semantics<parallel>, #tpu.dimension_semantics<parallel>], iteration_bounds = array<i64: 2, 1>, scalar_prefetch = 0 : i64, scratch_operands = 0 : i64, tpu.core_type = #tpu.core_type<tc>, window_params = [{transform_indices = @transform_0, window_bounds = array<i64: 1, 256, 36>}, {pipeline_mode = #tpu.pipeline_mode<synchronous>, transform_indices = @transform_1, window_bounds = array<i64: 36, 128>}, {pipeline_mode = #tpu.pipeline_mode<synchronous>, transform_indices = @transform_2, window_bounds = array<i64: 1, 128>}, {pipeline_mode = #tpu.pipeline_mode<synchronous>, transform_indices = @transform_3, window_bounds = array<i64: 1, 128>}, {transform_indices = @transform_4, window_bounds = array<i64: 1, 8, 256>}]} {
    %c0 = arith.constant 0 : index
    %c0_0 = arith.constant 0 : index
    %c0_1 = arith.constant 0 : index
    %0 = vector.load %arg2[%c0, %c0_0, %c0_1] : memref<1x256x36xbf16, #tpu.memory_space<vmem>>, vector<1x256x36xbf16>
    %1 = vector.shape_cast %0 : vector<1x256x36xbf16> to vector<256x36xbf16>
    %c0_2 = arith.constant 0 : index
    %c0_3 = arith.constant 0 : index
    %2 = vector.load %arg3[%c0_2, %c0_3] : memref<36x128xbf16, #tpu.memory_space<vmem>>, vector<36x128xbf16>
    %cst = arith.constant dense<0.000000e+00> : vector<256x128xf32>
    %3 = tpu.matmul %1, %2, %cst {dimension_numbers = #tpu.dot_dimension_numbers<[1], [0], [0], [1], [0, 0, 1, 1], [], []>} : vector<256x36xbf16>, vector<36x128xbf16>, vector<256x128xf32> -> vector<256x128xf32>
    %c0_4 = arith.constant 0 : index
    %c0_5 = arith.constant 0 : index
    %4 = vector.load %arg4[%c0_4, %c0_5] : memref<1x128xf32, #tpu.memory_space<vmem>>, vector<1x128xf32>
    %5 = vector.broadcast %4 : vector<1x128xf32> to vector<256x128xf32>
    %6 = arith.mulf %3, %5 : vector<256x128xf32>
    %c0_6 = arith.constant 0 : index
    %c0_7 = arith.constant 0 : index
    %7 = vector.load %arg5[%c0_6, %c0_7] : memref<1x128xf32, #tpu.memory_space<vmem>>, vector<1x128xf32>
    %8 = vector.broadcast %7 : vector<1x128xf32> to vector<256x128xf32>
    %9 = arith.addf %6, %8 : vector<256x128xf32>
    %cst_8 = arith.constant 0.000000e+00 : f32
    %10 = vector.broadcast %cst_8 : f32 to vector<256x128xf32>
    %11 = arith.maximumf %9, %10 : vector<256x128xf32>
    %12 = tpu.transpose %11, [1, 0] : vector<256x128xf32> -> vector<128x256xf32>
    %13 = vector.extract_strided_slice %12 {offsets = [0, 0], sizes = [8, 256], strides = [1, 1]} : vector<128x256xf32> to vector<8x256xf32>
    %c0_9 = arith.constant 0 : index
    %c0_10 = arith.constant 0 : index
    %c0_11 = arith.constant 0 : index
    %14 = vector.load %arg6[%c0_9, %c0_10, %c0_11] : memref<1x8x256xf32, #tpu.memory_space<vmem>>, vector<1x8x256xf32>
    %15 = vector.shape_cast %14 : vector<1x8x256xf32> to vector<8x256xf32>
    %16 = vector.shape_cast %13 : vector<8x256xf32> to vector<1x8x256xf32>
    tpu.vector_store %arg6[%c0_9, %c0_10, %c0_11], %16 {strides = array<i32>} : memref<1x8x256xf32, #tpu.memory_space<vmem>>, vector<1x8x256xf32>,
    return
  }
  func.func @transform_0(%arg0: i32, %arg1: i32) -> (i32, i32, i32) {
    %c0_i32 = arith.constant 0 : i32
    %c0_i32_0 = arith.constant 0 : i32
    return %arg0, %arg1, %c0_i32 : i32, i32, i32
  }
  func.func @transform_1(%arg0: i32, %arg1: i32) -> (i32, i32) {
    %c0_i32 = arith.constant 0 : i32
    %c0_i32_0 = arith.constant 0 : i32
    %c0_i32_1 = arith.constant 0 : i32
    return %c0_i32, %c0_i32_0 : i32, i32
  }
  func.func @transform_2(%arg0: i32, %arg1: i32) -> (i32, i32) {
    %c0_i32 = arith.constant 0 : i32
    %c0_i32_0 = arith.constant 0 : i32
    %c0_i32_1 = arith.constant 0 : i32
    return %c0_i32, %c0_i32_0 : i32, i32
  }
  func.func @transform_3(%arg0: i32, %arg1: i32) -> (i32, i32) {
    %c0_i32 = arith.constant 0 : i32
    %c0_i32_0 = arith.constant 0 : i32
    %c0_i32_1 = arith.constant 0 : i32
    return %c0_i32, %c0_i32_0 : i32, i32
  }
  func.func @transform_4(%arg0: i32, %arg1: i32) -> (i32, i32, i32) {
    %c0_i32 = arith.constant 0 : i32
    %c0_i32_0 = arith.constant 0 : i32
    return %arg0, %c0_i32, %arg1 : i32, i32, i32
  }
}

</mosaic_0001>

<bundles_post_ra>
// kernel: conv_bn_relu.3
= control target key start
LH: loop header
LB: loop body
LE: loop exit
PB: predicated region body
PF: predicated region fallthrough
CT: control target
= control target key end

     0   :  { %s1054_s15 = smov 0   ;;  %s1056_s16 = smov 0   ;;  %s1214_s0 = inlined_call_operand.vmem [shape: bf16[2,256,36], index: 0, kind: input, shape index: {}]   ;;  %s1215_s1 = inlined_call_operand.vmem [shape: bf16[36,128], index: 1, kind: input, shape index: {}]   ;;  %s1216_s2 = inlined_call_operand.vmem [shape: f32[1,128], index: 2, kind: input, shape index: {}]   ;;  %s1217_s3 = inlined_call_operand.vmem [shape: f32[1,128], index: 3, kind: input, shape index: {}]   ;;  %s1218_s4 = inlined_call_operand.vmem [shape: f32[2,8,256], index: 4, kind: output, shape index: {}]  }
   0x1   :  { %s1058_s17 = smov 0  }
   0x2 LB: > { %s26_s18 = sadd.s32 1, %s1023_s16  ;;  %p851_p0 = scmp.ge.s32.totalorder %s1027_s17, 1  ;;  %s1027_s17 = sphi %s1058_s17, %s14_s17   ;;  %s1023_s16 = sphi %s1056_s16, %s1220_s16   ;;  %s1019_s15 = sphi %s1054_s15, %s1219_s15  }
   0x3   : > { %p28_p1 = scmp.ge.s32.totalorder %s26_s18, 2  ;;  %p183_p2 = scmp.lt.s32.totalorder %s1027_s17, 3 }
   0x5   : > { %s1222_s18 = smov (%p28_p1, %s26_s18), 0  ;;  %p184_p3 = pnand %p851_p0, %p183_p2 }
   0x6   : > { %v986_v0 = vld [vmem:[%s1215_s1] sm:$0xff] (!%p184_p3)   ;;  %v987_v1 = vld [vmem:[%s1215_s1 + $0x8] sm:$0xff] (!%p184_p3)   ;;  %p218_p4 = scmp.lt.s32.totalorder (!%p184_p3), %s1019_s15, 1  ;;  %v988_v2 = vld [vmem:[%s1215_s1 + $0x10] ss:$0 sps:$4 sm:$0x33] (!%p184_p3)  }
   0x7   : > { %187 = sbr.rel (%p184_p3) target bundleno = 369 (0x171), region = 36  ;;  %916 = vmatprep.subr.bf16.mxu0 (!%p184_p3), %v986_v0  ;;  %954 = vmatprep.subr.bf16.mxu1 (!%p184_p3), %v986_v0  ;;  %vm419_vm0 = vcmask (!%p184_p3), 1041408   ;;  %vm370_vm1 = vcmask (!%p184_p3), 293888   ;;  %v1124_v20 = vld [vmem:[%s1216_s2] ss:$0 sm:$0xff] (!%p184_p3) }
   0x8   : > { %917 = vmatpush3.bf16.msra.mxu0 (!%p184_p3), %v986_v0  ;;  %957 = vmatpush3.bf16.msra.mxu1 (!%p184_p3), %v986_v0  ;;  %v421_v4 = vsel (!%p184_p3), %vm419_vm0, %v988_v2, 0  ;;  %v1129_v25 = vld [vmem:[%s1217_s3] ss:$0 sm:$0xff] (!%p184_p3) }
   0x9   : > { %918 = vmatprep.subr.bf16.mxu0 (!%p184_p3), %v987_v1  ;;  %955 = vmatprep.subr.bf16.mxu1 (!%p184_p3), %v987_v1 }
   0xc   : > { %919 = vmatpush3.bf16.msra.mxu0 (!%p184_p3), %v987_v1  ;;  %958 = vmatpush3.bf16.msra.mxu1 (!%p184_p3), %v987_v1 }
   0xd   : > { %960 = vmatprep.subr.msk.bf16.mxu0 (!%p184_p3), %vm419_vm0, %v988_v2  ;;  %961 = vmatprep.subr.msk.bf16.mxu1 (!%p184_p3), %vm419_vm0, %v988_v2 }
   0xe   : > { %s1224_s15 = smov (!%p218_p4, %s1019_s15), 1 }
   0xf   : > { %s895_s25 = sshll.u32 %s1224_s15, 7  ;;  %s896_s7 = sshll.u32 %s1224_s15, 4 }
  0x10   : > { %s1087_s28 = scalar_lea.vmem %s1214_s0, %s895_s25  ;;  %921 = vmatpush3.bf16.msra.mxu0 %v421_v4  ;;  %959 = vmatpush3.bf16.msra.mxu1 %v421_v4  ;;  %s235_s10 = scalar_lea.vmem %s1218_s4, %s896_s7 }
  0x11   : > { %v989_v3 = vld [vmem:[%s1087_s28] sm:$0xff]   ;;  %v991_v6 = vld [vmem:[%s1087_s28 + $0x8] sm:$0xff]   ;;  %v993_v8 = vld [vmem:[%s1087_s28 + $0x10] sm:$0xff]  }
  0x12   : > { %v990_v5 = vld [vmem:[%s1087_s28 + $0x40] sm:$0xff]   ;;  %922 = vmatprep.mubr.msk.bf16.mxu0 %vm370_vm1, %v989_v3  ;;  %v992_v7 = vld [vmem:[%s1087_s28 + $0x48] sm:$0xff]   ;;  %v994_v9 = vld [vmem:[%s1087_s28 + $0x50] sm:$0xff]  }
  0x13   : > { %938 = vmatprep.mubr.msk.bf16.mxu1 %vm370_vm1, %v990_v5  ;;  %923 = vmatmul.mubr.msk.bf16.vlgmr.msra.gmra.mrb[0].mxu0 %vm370_vm1, %v991_v6  ;;  %v995_v10 = vld [vmem:[%s1087_s28 + $0x18] sm:$0xff]   ;;  %v997_v12 = vld [vmem:[%s1087_s28 + $0x20] sm:$0xff]   ;;  %v999_v14 = vld [vmem:[%s1087_s28 + $0x28] sm:$0xff]  }
  0x14   : > { %939 = vmatmul.mubr.msk.bf16.vlgmr.msra.gmra.mrb[0].mxu1 %vm370_vm1, %v992_v7  ;;  %926 = vmatprep.mubr.msk.bf16.mxu0 %vm370_vm1, %v993_v8  ;;  %v996_v11 = vld [vmem:[%s1087_s28 + $0x58] sm:$0xff]   ;;  %v998_v13 = vld [vmem:[%s1087_s28 + $0x60] sm:$0xff]   ;;  %v1000_v15 = vld [vmem:[%s1087_s28 + $0x68] sm:$0xff]  }
  0x15   : > { %942 = vmatprep.mubr.msk.bf16.mxu1 %vm370_vm1, %v994_v9  ;;  %v1001_v16 = vld [vmem:[%s1087_s28 + $0x30] sm:$0xff]   ;;  %v1003_v18 = vld [vmem:[%s1087_s28 + $0x38] sm:$0xff]  }
  0x16   : > { %v1002_v17 = vld [vmem:[%s1087_s28 + $0x70] sm:$0xff]   ;;  %v1004_v19 = vld [vmem:[%s1087_s28 + $0x78] sm:$0xff]  }
  0x1b   : > { %927 = vmatmul.mubr.msk.bf16.gmra.mrb[4].mxu0 %vm370_vm1, %v995_v10 }
  0x1c   : > { %943 = vmatmul.mubr.msk.bf16.gmra.mrb[4].mxu1 %vm370_vm1, %v996_v11  ;;  %930 = vmatprep.mubr.msk.bf16.mxu0 %vm370_vm1, %v997_v12 }
  0x1d   : > { %946 = vmatprep.mubr.msk.bf16.mxu1 %vm370_vm1, %v998_v13 }
  0x23   : > { %931 = vmatmul.mubr.msk.bf16.gmra.mrb[8].mxu0 %vm370_vm1, %v999_v14 }
  0x24   : > { %947 = vmatmul.mubr.msk.bf16.gmra.mrb[8].mxu1 %vm370_vm1, %v1000_v15  ;;  %934 = vmatprep.mubr.msk.bf16.mxu0 %vm370_vm1, %v1001_v16 }
  0x25   : > { %950 = vmatprep.mubr.msk.bf16.mxu1 %vm370_vm1, %v1002_v17 }
  0x2b   : > { %935 = vmatmul.mubr.msk.bf16.gmra.mrb[12].mxu0 %vm370_vm1, %v1003_v18 }
  0x2c   : > { %951 = vmatmul.mubr.msk.bf16.gmra.mrb[12].mxu1 %vm370_vm1, %v1004_v19 }
  0xe6   : > { %v924_v21 = vpop.f32.mrb[0].mxu0 }
  0xe7   : > { %v940_v22 = vpop.f32.mrb[0].mxu1  ;;  %v457_v23 = vpop.f32.mrb[1].mxu0  ;;  %v593_v36 = vmul.f32 %v924_v21, %v1124_v20 }
  0xe8   : > { %v521_v24 = vpop.f32.mrb[1].mxu1  ;;  %v591_v26 = vmul.f32 %v1124_v20, %v457_v23  ;;  %v925_v28 = vpop.f32.mrb[2].mxu0  ;;  %v609_v37 = vmul.f32 %v940_v22, %v1124_v20 }
  0xe9   : > { %v607_v27 = vmul.f32 %v1124_v20, %v521_v24  ;;  %v941_v29 = vpop.f32.mrb[2].mxu1  ;;  %v460_v30 = vpop.f32.mrb[3].mxu0  ;;  %v594_v44 = vmul.f32 %v925_v28, %v1124_v20  ;;  %v632_v53 = vadd.f32 %v1129_v25, %v593_v36 }
  0xea   : > { %v524_v31 = vpop.f32.mrb[3].mxu1  ;;  %v592_v32 = vmul.f32 %v1124_v20, %v460_v30  ;;  %v630_v35 = vadd.f32 %v1129_v25, %v591_v26  ;;  %v610_v45 = vmul.f32 %v941_v29, %v1124_v20  ;;  %v648_v52 = vadd.f32 %v1129_v25, %v609_v37 }
  0xeb   : > { %v608_v33 = vmul.f32 %v1124_v20, %v524_v31  ;;  %v646_v34 = vadd.f32 %v1129_v25, %v607_v27  ;;  %v664_v59 = vmax.f32 %v632_v53, 0.0  ;;  %v633_v61 = vadd.f32 %v1129_v25, %v594_v44 }
  0xec   : > { %v662_v39 = vmax.f32 %v630_v35, 0.0  ;;  %v631_v41 = vadd.f32 %v1129_v25, %v592_v32  ;;  %v680_v58 = vmax.f32 %v648_v52, 0.0  ;;  %v649_v60 = vadd.f32 %v1129_v25, %v610_v45 }
  0xed   : > { %v678_v38 = vmax.f32 %v646_v34, 0.0  ;;  %v647_v40 = vadd.f32 %v1129_v25, %v608_v33  ;;  %v665_v7 = vmax.f32 %v633_v61, 0.0 }
  0xee   : > { %694 = vxpose.xlu0.b32.start [1/16] (narrow) %v662_v39, 8  ;;  %v928_v42 = vpop.f32.mrb[4].mxu0  ;;  %v663_v49 = vmax.f32 %v631_v41, 0.0  ;;  %v681_v6 = vmax.f32 %v649_v60, 0.0 }
  0xef   : > { %726 = vxpose.xlu1.b32.start [1/16] (narrow) %v678_v38, 8  ;;  %v944_v43 = vpop.f32.mrb[4].mxu1  ;;  %v473_v46 = vpop.f32.mrb[5].mxu0  ;;  %v679_v48 = vmax.f32 %v647_v40, 0.0  ;;  %v597_v14 = vmul.f32 %v928_v42, %v1124_v20 }
  0xf0   : > { %v537_v47 = vpop.f32.mrb[5].mxu1  ;;  %v929_v50 = vpop.f32.mrb[6].mxu0  ;;  %v595_v56 = vmul.f32 %v1124_v20, %v473_v46  ;;  %v613_v15 = vmul.f32 %v944_v43, %v1124_v20 }
  0xf1   : > { %v945_v51 = vpop.f32.mrb[6].mxu1  ;;  %v476_v55 = vpop.f32.mrb[7].mxu0  ;;  %v611_v57 = vmul.f32 %v1124_v20, %v537_v47  ;;  %v598_v21 = vmul.f32 %v929_v50, %v1124_v20  ;;  %v636_v29 = vadd.f32 %v1129_v25, %v597_v14 }
  0xf2   : > { %v540_v54 = vpop.f32.mrb[7].mxu1  ;;  %695 = vxpose.xlu0.b32.cont [2/16] (narrow) %v663_v49, 8  ;;  %v634_v63 = vadd.f32 %v1129_v25, %v595_v56  ;;  %v596_v5 = vmul.f32 %v1124_v20, %v476_v55  ;;  %v614_v22 = vmul.f32 %v945_v51, %v1124_v20  ;;  %v652_v28 = vadd.f32 %v1129_v25, %v613_v15 }
  0xf3   : > { %727 = vxpose.xlu1.b32.cont [2/16] (narrow) %v679_v48, 8  ;;  %v650_v62 = vadd.f32 %v1129_v25, %v611_v57  ;;  %v612_v4 = vmul.f32 %v1124_v20, %v540_v54  ;;  %v668_v37 = vmax.f32 %v636_v29, 0.0  ;;  %v637_v39 = vadd.f32 %v1129_v25, %v598_v21 }
  0xf4   : > { %v666_v13 = vmax.f32 %v634_v63, 0.0  ;;  %v635_v17 = vadd.f32 %v1129_v25, %v596_v5  ;;  %v684_v36 = vmax.f32 %v652_v28, 0.0  ;;  %v653_v38 = vadd.f32 %v1129_v25, %v614_v22 }
  0xf5   : > { %v682_v12 = vmax.f32 %v650_v62, 0.0  ;;  %v651_v16 = vadd.f32 %v1129_v25, %v612_v4  ;;  %v669_v45 = vmax.f32 %v637_v39, 0.0 }
  0xf6   : > { %696 = vxpose.xlu0.b32.cont [3/16] (narrow) %v664_v59, 8  ;;  %v932_v0 = vpop.f32.mrb[8].mxu0  ;;  %v667_v27 = vmax.f32 %v635_v17, 0.0  ;;  %v685_v44 = vmax.f32 %v653_v38, 0.0 }
  0xf7   : > { %728 = vxpose.xlu1.b32.cont [3/16] (narrow) %v680_v58, 8  ;;  %v948_v1 = vpop.f32.mrb[8].mxu1  ;;  %v489_v2 = vpop.f32.mrb[9].mxu0  ;;  %v683_v26 = vmax.f32 %v651_v16, 0.0  ;;  %v601_v48 = vmul.f32 %v932_v0, %v1124_v20 }
  0xf8   : > { %v553_v3 = vpop.f32.mrb[9].mxu1  ;;  %v933_v8 = vpop.f32.mrb[10].mxu0  ;;  %v599_v34 = vmul.f32 %v1124_v20, %v489_v2  ;;  %v617_v49 = vmul.f32 %v948_v1, %v1124_v20 }
  0xf9   : > { %v949_v9 = vpop.f32.mrb[10].mxu1  ;;  %v492_v11 = vpop.f32.mrb[11].mxu0  ;;  %v615_v35 = vmul.f32 %v1124_v20, %v553_v3  ;;  %v602_v52 = vmul.f32 %v933_v8, %v1124_v20  ;;  %v640_v57 = vadd.f32 %v1129_v25, %v601_v48 }
  0xfa   : > { %v556_v10 = vpop.f32.mrb[11].mxu1  ;;  %697 = vxpose.xlu0.b32.cont [4/16] (narrow) %v665_v7, 8  ;;  %v638_v41 = vadd.f32 %v1129_v25, %v599_v34  ;;  %v600_v43 = vmul.f32 %v1124_v20, %v492_v11  ;;  %v618_v53 = vmul.f32 %v949_v9, %v1124_v20  ;;  %v656_v56 = vadd.f32 %v1129_v25, %v617_v49 }
  0xfb   : > { %729 = vxpose.xlu1.b32.cont [4/16] (narrow) %v681_v6, 8  ;;  %v654_v40 = vadd.f32 %v1129_v25, %v615_v35  ;;  %v616_v42 = vmul.f32 %v1124_v20, %v556_v10  ;;  %v672_v61 = vmax.f32 %v640_v57, 0.0  ;;  %v641_v63 = vadd.f32 %v1129_v25, %v602_v52 }
  0xfc   : > { %v670_v47 = vmax.f32 %v638_v41, 0.0  ;;  %v639_v51 = vadd.f32 %v1129_v25, %v600_v43  ;;  %v688_v60 = vmax.f32 %v656_v56, 0.0  ;;  %v657_v62 = vadd.f32 %v1129_v25, %v618_v53 }
  0xfd   : > { %v686_v46 = vmax.f32 %v654_v40, 0.0  ;;  %v655_v50 = vadd.f32 %v1129_v25, %v616_v42  ;;  %v673_v5 = vmax.f32 %v641_v63, 0.0 }
  0xfe   : > { %698 = vxpose.xlu0.b32.cont [5/16] (narrow) %v666_v13, 8  ;;  %v1157_v18 = vpop.f32.mrb[12].mxu0  ;;  %v671_v55 = vmax.f32 %v639_v51, 0.0  ;;  %v689_v4 = vmax.f32 %v657_v62, 0.0 }
  0xff   : > { %730 = vxpose.xlu1.b32.cont [5/16] (narrow) %v682_v12, 8  ;;  %v1159_v19 = vpop.f32.mrb[12].mxu1  ;;  %v505_v23 = vpop.f32.mrb[13].mxu0  ;;  %v687_v54 = vmax.f32 %v655_v50, 0.0  ;;  %v605_v8 = vmul.f32 %v1157_v18, %v1124_v20 }
 0x100   : > { %v569_v24 = vpop.f32.mrb[13].mxu1  ;;  %v937_v30 = vpop.f32.mrb[14].mxu0  ;;  %v603_v58 = vmul.f32 %v1124_v20, %v505_v23  ;;  %v621_v9 = vmul.f32 %v1159_v19, %v1124_v20 }
 0x101   : > { %v953_v31 = vpop.f32.mrb[14].mxu1  ;;  %v508_v33 = vpop.f32.mrb[15].mxu0  ;;  %v619_v59 = vmul.f32 %v1124_v20, %v569_v24  ;;  %v606_v12 = vmul.f32 %v937_v30, %v1124_v20  ;;  %v644_v17 = vadd.f32 %v1129_v25, %v605_v8 }
 0x102   : > { %v572_v32 = vpop.f32.mrb[15].mxu1  ;;  %699 = vxpose.xlu0.b32.cont [6/16] (narrow) %v667_v27, 8  ;;  %v642_v1 = vadd.f32 %v1129_v25, %v603_v58  ;;  %v604_v3 = vmul.f32 %v1124_v20, %v508_v33  ;;  %v622_v13 = vmul.f32 %v953_v31, %v1124_v20  ;;  %v660_v16 = vadd.f32 %v1129_v25, %v621_v9 }
 0x103   : > { %731 = vxpose.xlu1.b32.cont [6/16] (narrow) %v683_v26, 8  ;;  %v658_v0 = vadd.f32 %v1129_v25, %v619_v59  ;;  %v620_v2 = vmul.f32 %v1124_v20, %v572_v32  ;;  %v676_v19 = vmax.f32 %v644_v17, 0.0  ;;  %v645_v22 = vadd.f32 %v1129_v25, %v606_v12 }
 0x104   : > { %v674_v7 = vmax.f32 %v642_v1, 0.0  ;;  %v643_v11 = vadd.f32 %v1129_v25, %v604_v3  ;;  %v692_v18 = vmax.f32 %v660_v16, 0.0  ;;  %v661_v21 = vadd.f32 %v1129_v25, %v622_v13 }
 0x105   : > { %v690_v6 = vmax.f32 %v658_v0, 0.0  ;;  %v659_v10 = vadd.f32 %v1129_v25, %v620_v2  ;;  %v677_v24 = vmax.f32 %v645_v22, 0.0 }
 0x106   : > { %700 = vxpose.xlu0.b32.cont [7/16] (narrow) %v668_v37, 8  ;;  %v675_v15 = vmax.f32 %v643_v11, 0.0  ;;  %v693_v23 = vmax.f32 %v661_v21, 0.0 }
 0x107   : > { %732 = vxpose.xlu1.b32.cont [7/16] (narrow) %v684_v36, 8  ;;  %v691_v14 = vmax.f32 %v659_v10, 0.0 }
 0x10a   : > { %701 = vxpose.xlu0.b32.cont [8/16] (narrow) %v669_v45, 8 }
 0x10b   : > { %733 = vxpose.xlu1.b32.cont [8/16] (narrow) %v685_v44, 8 }
 0x10e   : > { %702 = vxpose.xlu0.b32.cont [9/16] (narrow) %v670_v47, 8 }
 0x10f   : > { %734 = vxpose.xlu1.b32.cont [9/16] (narrow) %v686_v46, 8 }
 0x112   : > { %703 = vxpose.xlu0.b32.cont [10/16] (narrow) %v671_v55, 8 }
 0x113   : > { %735 = vxpose.xlu1.b32.cont [10/16] (narrow) %v687_v54, 8 }
 0x116   : > { %704 = vxpose.xlu0.b32.cont [11/16] (narrow) %v672_v61, 8 }
 0x117   : > { %736 = vxpose.xlu1.b32.cont [11/16] (narrow) %v688_v60, 8 }
 0x11a   : > { %705 = vxpose.xlu0.b32.cont [12/16] (narrow) %v673_v5, 8 }
 0x11b   : > { %737 = vxpose.xlu1.b32.cont [12/16] (narrow) %v689_v4, 8 }
 0x11e   : > { %706 = vxpose.xlu0.b32.cont [13/16] (narrow) %v674_v7, 8 }
 0x11f   : > { %738 = vxpose.xlu1.b32.cont [13/16] (narrow) %v690_v6, 8 }
 0x122   : > { %707 = vxpose.xlu0.b32.cont [14/16] (narrow) %v675_v15, 8 }
 0x123   : > { %739 = vxpose.xlu1.b32.cont [14/16] (narrow) %v691_v14, 8 }
 0x126   : > { %708 = vxpose.xlu0.b32.cont [15/16] (narrow) %v676_v19, 8 }
 0x127   : > { %740 = vxpose.xlu1.b32.cont [15/16] (narrow) %v692_v18, 8 }
 0x12a   : > { %709 = vxpose.xlu0.b32.end [16/16] (narrow) %v677_v24, 8 }
 0x12b   : > { %741 = vxpose.xlu1.b32.end [16/16] (narrow) %v693_v23, 8 }
 0x16e   : > { %v710_v26 = vpop.trf.xlu0 }
 0x16f   : > { %v742_v20 = vpop.trf.xlu1  ;;  %758 = vst [vmem:[%s235_s10] sm:$0xff] %v710_v26 }
 0x170   : > { %759 = vst [vmem:[%s235_s10 + $0x8] sm:$0xff] %v742_v20 }
 0x171 PF: > { %s14_s17 = sadd.s32 1, %s1027_s17   ;;  %s1219_s15 = smov %s1023_s16 }
 0x172   : > { %p11_p5 = scmp.ge.s32.totalorder %s14_s17, 4   ;;  %s1220_s16 = smov %s1222_s18 }
 0x174   :  { %13 = sbr.rel (!%p11_p5) target bundleno = 2 (0x2), region = 66 }

// kernel: conv_bn_relu.2
= control target key start
LH: loop header
LB: loop body
LE: loop exit
PB: predicated region body
PF: predicated region fallthrough
CT: control target
= control target key end

     0   :  { %s982_s12 = smov 0   ;;  %s984_s13 = smov 0   ;;  %s1095_s0 = inlined_call_operand.vmem [shape: bf16[2,256,36], index: 0, kind: input, shape index: {}]   ;;  %s1096_s1 = inlined_call_operand.vmem [shape: bf16[36,128], index: 1, kind: input, shape index: {}]   ;;  %s1097_s2 = inlined_call_operand.vmem [shape: f32[16,128], index: 2, kind: output, shape index: {0}]   ;;  %s1098_s3 = inlined_call_operand.vmem [shape: f32[16,128], index: 3, kind: output, shape index: {1}]  }
   0x1   :  { %s986_s14 = smov 0  }
   0x2 LB: > { %s26_s15 = sadd.s32 1, %s956_s13  ;;  %p787_p0 = scmp.ge.s32.totalorder %s960_s14, 1  ;;  %s960_s14 = sphi %s986_s14, %s14_s14   ;;  %s956_s13 = sphi %s984_s13, %s1100_s13   ;;  %s952_s12 = sphi %s982_s12, %s1099_s12  }
   0x3   : > { %p28_p1 = scmp.ge.s32.totalorder %s26_s15, 2  ;;  %p163_p2 = scmp.lt.s32.totalorder %s960_s14, 3 }
   0x5   : > { %s1102_s15 = smov (%p28_p1, %s26_s15), 0  ;;  %p164_p3 = pnand %p787_p0, %p163_p2 }
   0x6   : > { %v919_v0 = vld [vmem:[%s1096_s1] sm:$0xff] (!%p164_p3)   ;;  %v920_v1 = vld [vmem:[%s1096_s1 + $0x8] sm:$0xff] (!%p164_p3)   ;;  %p197_p4 = scmp.lt.s32.totalorder (!%p164_p3), %s952_s12, 1  ;;  %v921_v2 = vld [vmem:[%s1096_s1 + $0x10] ss:$0 sps:$4 sm:$0x33] (!%p164_p3)  }
   0x7   : > { %167 = sbr.rel (%p164_p3) target bundleno = 312 (0x138), region = 28  ;;  %849 = vmatprep.subr.bf16.mxu0 (!%p164_p3), %v919_v0  ;;  %887 = vmatprep.subr.bf16.mxu1 (!%p164_p3), %v919_v0  ;;  %vm400_vm0 = vcmask (!%p164_p3), 1041408   ;;  %vm351_vm1 = vcmask (!%p164_p3), 293888  }
   0x8   : > { %850 = vmatpush3.bf16.msra.mxu0 (!%p164_p3), %v919_v0  ;;  %890 = vmatpush3.bf16.msra.mxu1 (!%p164_p3), %v919_v0  ;;  %v402_v4 = vsel (!%p164_p3), %vm400_vm0, %v921_v2, 0 }
   0x9   : > { %851 = vmatprep.subr.bf16.mxu0 (!%p164_p3), %v920_v1  ;;  %888 = vmatprep.subr.bf16.mxu1 (!%p164_p3), %v920_v1 }
   0xc   : > { %852 = vmatpush3.bf16.msra.mxu0 (!%p164_p3), %v920_v1  ;;  %891 = vmatpush3.bf16.msra.mxu1 (!%p164_p3), %v920_v1 }
   0xd   : > { %893 = vmatprep.subr.msk.bf16.mxu0 (!%p164_p3), %vm400_vm0, %v921_v2  ;;  %894 = vmatprep.subr.msk.bf16.mxu1 (!%p164_p3), %vm400_vm0, %v921_v2 }
   0xe   : > { %s1104_s12 = smov (!%p197_p4, %s952_s12), 1 }
   0xf   : > { %s829_s22 = sshll.u32 %s1104_s12, 7  ;;  %s790_s26 = sshll.u32 %s1104_s12, 3 }
  0x10   : > { %s1015_s25 = scalar_lea.vmem %s1095_s0, %s829_s22  ;;  %854 = vmatpush3.bf16.msra.mxu0 %v402_v4  ;;  %892 = vmatpush3.bf16.msra.mxu1 %v402_v4  ;;  %s210_s29 = scalar_lea.vmem %s1097_s2, %s790_s26 }
  0x11   : > { %v922_v3 = vld [vmem:[%s1015_s25] sm:$0xff]   ;;  %v923_v5 = vld [vmem:[%s1015_s25 + $0x8] sm:$0xff]   ;;  %v924_v6 = vld [vmem:[%s1015_s25 + $0x10] sm:$0xff]   ;;  %s216_s5 = scalar_lea.vmem %s1098_s3, %s790_s26 }
  0x12   : > { %855 = vmatprep.mubr.msk.bf16.mxu0 %vm351_vm1, %v922_v3  ;;  %v930_v7 = vld [vmem:[%s1015_s25 + $0x40] sm:$0xff]   ;;  %v931_v8 = vld [vmem:[%s1015_s25 + $0x48] sm:$0xff]   ;;  %v932_v9 = vld [vmem:[%s1015_s25 + $0x50] sm:$0xff]  }
  0x13   : > { %856 = vmatmul.mubr.msk.bf16.vlgmr.msra.gmra.mrb[0].mxu0 %vm351_vm1, %v923_v5  ;;  %871 = vmatprep.mubr.msk.bf16.mxu1 %vm351_vm1, %v930_v7  ;;  %v925_v10 = vld [vmem:[%s1015_s25 + $0x18] sm:$0xff]   ;;  %v926_v11 = vld [vmem:[%s1015_s25 + $0x20] sm:$0xff]   ;;  %v927_v14 = vld [vmem:[%s1015_s25 + $0x28] sm:$0xff]  }
  0x14   : > { %859 = vmatprep.mubr.msk.bf16.mxu0 %vm351_vm1, %v924_v6  ;;  %872 = vmatmul.mubr.msk.bf16.vlgmr.msra.gmra.mrb[0].mxu1 %vm351_vm1, %v931_v8  ;;  %v933_v12 = vld [vmem:[%s1015_s25 + $0x58] sm:$0xff]   ;;  %v934_v13 = vld [vmem:[%s1015_s25 + $0x60] sm:$0xff]   ;;  %v928_v15 = vld [vmem:[%s1015_s25 + $0x30] sm:$0xff]  }
  0x15   : > { %875 = vmatprep.mubr.msk.bf16.mxu1 %vm351_vm1, %v932_v9  ;;  %v935_v16 = vld [vmem:[%s1015_s25 + $0x68] sm:$0xff]   ;;  %v936_v17 = vld [vmem:[%s1015_s25 + $0x70] sm:$0xff]   ;;  %v929_v18 = vld [vmem:[%s1015_s25 + $0x38] sm:$0xff]  }
  0x16   : > { %v937_v19 = vld [vmem:[%s1015_s25 + $0x78] sm:$0xff]  }
  0x1b   : > { %860 = vmatmul.mubr.msk.bf16.gmra.mrb[4].mxu0 %vm351_vm1, %v925_v10 }
  0x1c   : > { %863 = vmatprep.mubr.msk.bf16.mxu0 %vm351_vm1, %v926_v11  ;;  %876 = vmatmul.mubr.msk.bf16.gmra.mrb[4].mxu1 %vm351_vm1, %v933_v12 }
  0x1d   : > { %879 = vmatprep.mubr.msk.bf16.mxu1 %vm351_vm1, %v934_v13 }
  0x23   : > { %864 = vmatmul.mubr.msk.bf16.gmra.mrb[8].mxu0 %vm351_vm1, %v927_v14 }
  0x24   : > { %867 = vmatprep.mubr.msk.bf16.mxu0 %vm351_vm1, %v928_v15  ;;  %880 = vmatmul.mubr.msk.bf16.gmra.mrb[8].mxu1 %vm351_vm1, %v935_v16 }
  0x25   : > { %883 = vmatprep.mubr.msk.bf16.mxu1 %vm351_vm1, %v936_v17 }
  0x2b   : > { %868 = vmatmul.mubr.msk.bf16.gmra.mrb[12].mxu0 %vm351_vm1, %v929_v18 }
  0x2c   : > { %884 = vmatmul.mubr.msk.bf16.gmra.mrb[12].mxu1 %vm351_vm1, %v937_v19 }
  0xe6   : > { %v857_v20 = vpop.f32.mrb[0].mxu0 }
  0xe7   : > { %v438_v21 = vpop.f32.mrb[1].mxu0  ;;  %v1049_v27 = vpop.f32.mrb[0].mxu1  ;;  %v604_v29 = vmul.f32 %v857_v20, %v857_v20 }
  0xe8   : > { %v858_v22 = vpop.f32.mrb[2].mxu0  ;;  %v602_v24 = vmul.f32 %v438_v21, %v438_v21  ;;  %v1051_v28 = vpop.f32.mrb[1].mxu1 }
  0xe9   : > { %v441_v23 = vpop.f32.mrb[3].mxu0  ;;  %v1053_v32 = vpop.f32.mrb[2].mxu1  ;;  %v605_v34 = vmul.f32 %v858_v22, %v858_v22 }
  0xea   : > { %v565_v25 = vadd.f32 %v441_v23, %v438_v21  ;;  %v603_v26 = vmul.f32 %v441_v23, %v441_v23  ;;  %v1055_v33 = vpop.f32.mrb[3].mxu1 }
  0xec   : > { %v566_v30 = vadd.f32 %v857_v20, %v565_v25  ;;  %v634_v31 = vadd.f32 %v603_v26, %v602_v24 }
  0xee   : > { %v635_v35 = vadd.f32 %v634_v31, %v604_v29  ;;  %v861_v36 = vpop.f32.mrb[4].mxu0  ;;  %v567_v37 = vadd.f32 %v858_v22, %v566_v30 }
  0xef   : > { %v454_v38 = vpop.f32.mrb[5].mxu0  ;;  %v1057_v47 = vpop.f32.mrb[4].mxu1  ;;  %v608_v49 = vmul.f32 %v861_v36, %v861_v36 }
  0xf0   : > { %v568_v39 = vadd.f32 %v567_v37, %v454_v38  ;;  %v606_v40 = vmul.f32 %v454_v38, %v454_v38  ;;  %v636_v41 = vadd.f32 %v635_v35, %v605_v34  ;;  %v862_v42 = vpop.f32.mrb[6].mxu0  ;;  %v518_v48 = vpop.f32.mrb[5].mxu1  ;;  %v618_v37 = vmul.f32 %v1051_v28, %v1051_v28 }
  0xf1   : > { %v457_v43 = vpop.f32.mrb[7].mxu0  ;;  %v1059_v52 = vpop.f32.mrb[6].mxu1  ;;  %v609_v54 = vmul.f32 %v862_v42, %v862_v42 }
  0xf2   : > { %v637_v44 = vadd.f32 %v636_v41, %v606_v40  ;;  %v569_v45 = vadd.f32 %v568_v39, %v457_v43  ;;  %v607_v46 = vmul.f32 %v457_v43, %v457_v43  ;;  %v521_v53 = vpop.f32.mrb[7].mxu1  ;;  %v620_v43 = vmul.f32 %v1049_v27, %v1049_v27 }
  0xf4   : > { %v570_v50 = vadd.f32 %v861_v36, %v569_v45  ;;  %v638_v51 = vadd.f32 %v637_v44, %v607_v46  ;;  %v621_v46 = vmul.f32 %v1053_v32, %v1053_v32 }
  0xf6   : > { %v639_v55 = vadd.f32 %v638_v51, %v608_v49  ;;  %v865_v56 = vpop.f32.mrb[8].mxu0  ;;  %v571_v57 = vadd.f32 %v862_v42, %v570_v50  ;;  %v619_v42 = vmul.f32 %v1055_v33, %v1055_v33 }
  0xf7   : > { %v470_v58 = vpop.f32.mrb[9].mxu0  ;;  %v881_v3 = vpop.f32.mrb[8].mxu1  ;;  %v612_v5 = vmul.f32 %v865_v56, %v865_v56 }
  0xf8   : > { %v572_v59 = vadd.f32 %v571_v57, %v470_v58  ;;  %v610_v60 = vmul.f32 %v470_v58, %v470_v58  ;;  %v640_v61 = vadd.f32 %v639_v55, %v609_v54  ;;  %v866_v62 = vpop.f32.mrb[10].mxu0  ;;  %v534_v4 = vpop.f32.mrb[9].mxu1  ;;  %v623_v57 = vmul.f32 %v521_v53, %v521_v53 }
  0xf9   : > { %v473_v63 = vpop.f32.mrb[11].mxu0  ;;  %v882_v8 = vpop.f32.mrb[10].mxu1  ;;  %v613_v10 = vmul.f32 %v866_v62, %v866_v62 }
  0xfa   : > { %v641_v0 = vadd.f32 %v640_v61, %v610_v60  ;;  %v573_v1 = vadd.f32 %v572_v59, %v473_v63  ;;  %v611_v2 = vmul.f32 %v473_v63, %v473_v63  ;;  %v537_v9 = vpop.f32.mrb[11].mxu1 }
  0xfc   : > { %v574_v6 = vadd.f32 %v865_v56, %v573_v1  ;;  %v642_v7 = vadd.f32 %v641_v0, %v611_v2  ;;  %v627_v1 = vmul.f32 %v537_v9, %v537_v9  ;;  %v628_v2 = vmul.f32 %v881_v3, %v881_v3 }
  0xfe   : > { %v643_v11 = vadd.f32 %v642_v7, %v612_v5  ;;  %v869_v12 = vpop.f32.mrb[12].mxu0  ;;  %v575_v13 = vadd.f32 %v866_v62, %v574_v6  ;;  %v626_v62 = vmul.f32 %v534_v4, %v534_v4  ;;  %v629_v6 = vmul.f32 %v882_v8, %v882_v8 }
  0xff   : > { %v486_v14 = vpop.f32.mrb[13].mxu0  ;;  %v885_v23 = vpop.f32.mrb[12].mxu1  ;;  %v616_v25 = vmul.f32 %v869_v12, %v869_v12 }
 0x100   : > { %v576_v15 = vadd.f32 %v575_v13, %v486_v14  ;;  %v614_v16 = vmul.f32 %v486_v14, %v486_v14  ;;  %v644_v17 = vadd.f32 %v643_v11, %v613_v10  ;;  %v870_v18 = vpop.f32.mrb[14].mxu0  ;;  %v550_v24 = vpop.f32.mrb[13].mxu1 }
 0x101   : > { %v489_v19 = vpop.f32.mrb[15].mxu0  ;;  %v886_v30 = vpop.f32.mrb[14].mxu1  ;;  %v617_v34 = vmul.f32 %v870_v18, %v870_v18 }
 0x102   : > { %v645_v20 = vadd.f32 %v644_v17, %v614_v16  ;;  %v577_v21 = vadd.f32 %v576_v15, %v489_v19  ;;  %v615_v22 = vmul.f32 %v489_v19, %v489_v19  ;;  %v553_v31 = vpop.f32.mrb[15].mxu1  ;;  %v632_v16 = vmul.f32 %v885_v23, %v885_v23 }
 0x103   : > { %v631_v15 = vmul.f32 %v553_v31, %v553_v31  ;;  %v633_v17 = vmul.f32 %v886_v30, %v886_v30 }
 0x104   : > { %v578_v26 = vadd.f32 %v869_v12, %v577_v21  ;;  %v646_v29 = vadd.f32 %v645_v20, %v615_v22 }
 0x106   : > { %v647_v35 = vadd.f32 %v646_v29, %v616_v25  ;;  %v579_v36 = vadd.f32 %v870_v18, %v578_v26 }
 0x108   : > { %v580_v38 = vadd.f32 %v579_v36, %v1051_v28  ;;  %v648_v39 = vadd.f32 %v647_v35, %v617_v34  ;;  %v622_v28 = vmul.f32 %v518_v48, %v518_v48 }
 0x10a   : > { %v649_v40 = vadd.f32 %v648_v39, %v618_v37  ;;  %v581_v41 = vadd.f32 %v580_v38, %v1055_v33  ;;  %v624_v33 = vmul.f32 %v1057_v47, %v1057_v47 }
 0x10c   : > { %v582_v44 = vadd.f32 %v1049_v27, %v581_v41  ;;  %v650_v45 = vadd.f32 %v649_v40, %v619_v42  ;;  %v625_v27 = vmul.f32 %v1059_v52, %v1059_v52 }
 0x10e   : > { %v651_v49 = vadd.f32 %v650_v45, %v620_v43  ;;  %v583_v50 = vadd.f32 %v1053_v32, %v582_v44 }
 0x110   : > { %v584_v51 = vadd.f32 %v583_v50, %v518_v48  ;;  %v652_v54 = vadd.f32 %v651_v49, %v621_v46 }
 0x112   : > { %v653_v55 = vadd.f32 %v652_v54, %v622_v28  ;;  %v585_v56 = vadd.f32 %v584_v51, %v521_v53 }
 0x114   : > { %v586_v58 = vadd.f32 %v1057_v47, %v585_v56  ;;  %v654_v59 = vadd.f32 %v653_v55, %v623_v57  ;;  %v630_v47 = vmul.f32 %v550_v24, %v550_v24 }
 0x116   : > { %v655_v60 = vadd.f32 %v654_v59, %v624_v33  ;;  %v587_v61 = vadd.f32 %v1059_v52, %v586_v58 }
 0x118   : > { %v588_v32 = vadd.f32 %v587_v61, %v534_v4  ;;  %v656_v63 = vadd.f32 %v655_v60, %v625_v27 }
 0x11a   : > { %v657_v48 = vadd.f32 %v656_v63, %v626_v62  ;;  %v589_v0 = vadd.f32 %v588_v32, %v537_v9 }
 0x11c   : > { %v590_v53 = vadd.f32 %v881_v3, %v589_v0  ;;  %v658_v5 = vadd.f32 %v657_v48, %v627_v1  ;;  %v671_v3 = vlaneseq }
 0x11e   : > { %v659_v7 = vadd.f32 %v658_v5, %v628_v2  ;;  %v591_v10 = vadd.f32 %v882_v8, %v590_v53  ;;  %v672_v26 = vshrl.u32 %v671_v3, 7 }
 0x120   : > { %v592_v11 = vadd.f32 %v591_v10, %v550_v24  ;;  %v660_v12 = vadd.f32 %v659_v7, %v629_v6  ;;  %vm673_vm2 = vcmp.eq.s32.totalorder %v672_v26, 0 }
 0x122   : > { %v661_v13 = vadd.f32 %v660_v12, %v630_v47  ;;  %v593_v14 = vadd.f32 %v592_v11, %v553_v31 }
 0x124   : > { %v594_v52 = vadd.f32 %v885_v23, %v593_v14  ;;  %v662_v4 = vadd.f32 %v661_v13, %v631_v15 }
 0x126   : > { %v595_v18 = vadd.f32 %v886_v30, %v594_v52  ;;  %v663_v19 = vadd.f32 %v662_v4, %v632_v16 }
 0x128   : > { %v596_v9 = vrot.slane %v595_v18, 4  ;;  %v664_v20 = vadd.f32 %v663_v19, %v633_v17 }
 0x12a   : > { %v597_v21 = vadd.f32 %v596_v9, %v595_v18  ;;  %v665_v22 = vrot.slane %v664_v20, 4 }
 0x12c   : > { %v598_v25 = vrot.slane %v597_v21, 2  ;;  %v666_v8 = vadd.f32 %v665_v22, %v664_v20 }
 0x12e   : > { %v599_v24 = vadd.f32 %v598_v25, %v597_v21  ;;  %v667_v29 = vrot.slane %v666_v8, 2 }
 0x130   : > { %v600_v34 = vrot.slane %v599_v24, 1  ;;  %v668_v31 = vadd.f32 %v667_v29, %v666_v8 }
 0x132   : > { %v601_v23 = vadd.f32 %v600_v34, %v599_v24  ;;  %v669_v30 = vrot.slane %v668_v31, 1 }
 0x134   : > { %v670_v35 = vadd.f32 %v669_v30, %v668_v31  ;;  %v674_v36 = vsel %vm673_vm2, %v601_v23, 0.0 }
 0x135   : > { %675 = vst [vmem:[%s210_s29] sm:$0xff] %v674_v36 }
 0x136   : > { %v676_v37 = vsel %vm673_vm2, %v670_v35, 0.0 }
 0x137   : > { %677 = vst [vmem:[%s216_s5] sm:$0xff] %v676_v37 }
 0x138 PF: > { %s14_s14 = sadd.s32 1, %s960_s14   ;;  %s1099_s12 = smov %s956_s13 }
 0x139   : > { %p11_p5 = scmp.ge.s32.totalorder %s14_s14, 4   ;;  %s1100_s13 = smov %s1102_s15 }
 0x13b   :  { %13 = sbr.rel (!%p11_p5) target bundleno = 2 (0x2), region = 70 }

</bundles_post_ra>
